<compile_context>
chip_gen: v5e
topology: v5e:2x2
jax: 0.10.0
libtpu: 0.0.40
codegen_flags: <defaults>
</compile_context>

<pallas_src>
import functools

import numpy as np
import jax
import jax.numpy as jnp
from jax import lax
from jax.experimental import pallas as pl
from jax.experimental.pallas import tpu as pltpu


def _round_up(x, m):
    return (x + m - 1) // m * m


def _pick_row_tile(cn_pad, target):
    """Largest multiple of 16 that divides cn_pad and is <= target."""
    best = 16
    t = 16
    while t <= min(cn_pad, target):
        if cn_pad % t == 0:
            best = t
        t += 16
    return best


def _inter_kernel(cnt_ref, f_row_ref, f_col_ref, lab_col_ref, valid_ref,
                  lab_row_ref, poscnt_ref, out_ref, *, tr, n_pad, inv_t):
    """Streams one (tr x n_pad) tile of the Gram matrix per grid step.

    grid = (row tiles [parallel], column class [arbitrary]).  The per-row
    denominator is accumulated in the resident output block and turned into
    pos_cnt * log(denom) on the last column step.
    """
    i = pl.program_id(0)          # row tile
    j = pl.program_id(1)          # column class (reduction axis)

    @pl.when(j == 0)
    def _init():
        out_ref[...] = jnp.zeros_like(out_ref)

    # Skip column classes with no positive labels (their contribution is 0).
    @pl.when(cnt_ref[j] > 0)
    def _accumulate():
        fr = f_row_ref[...]                       # (tr, d_pad) bf16
        fc = f_col_ref[...]                       # (n_pad, d_pad) bf16
        g = lax.dot_general(fr, fc, (((1,), (1,)), ((), ())),
                            preferred_element_type=jnp.float32) * inv_t
        valid = valid_ref[...]                    # (1, n_pad): 1 for real cols
        lab_col = lab_col_ref[0]                  # (1, n_pad)
        neg = jnp.float32(-1e30)
        # per-(row, column-class) max over the real instances of this class
        gmax = jnp.max(jnp.where(valid > 0.5, g, neg), axis=1, keepdims=True)
        e = jnp.exp(jnp.where(valid > 0.5, g - gmax, 0.0))
        # mask_inter = lab_row * lab_col * (global_row != global_col)
        row_ids = i * tr + lax.broadcasted_iota(jnp.int32, (tr, n_pad), 0)
        col_ids = j * n_pad + lax.broadcasted_iota(jnp.int32, (tr, n_pad), 1)
        contrib = jnp.where(row_ids != col_ids, e * lab_col, 0.0)
        partial = jnp.sum(contrib, axis=1, keepdims=True)       # (tr, 1)
        out_ref[...] = out_ref[...] + lab_row_ref[...] * partial

    @pl.when(j == pl.num_programs(1) - 1)
    def _finalize():
        d = out_ref[...]
        d = jnp.where(d <= 0.0, jnp.float32(1.0), d)
        # TODO(synk): `all_mask` is undefined upstream; interpreted as the
        # per-row positives mask, so each row contributes pos_cnt * log(denom).
        out_ref[...] = poscnt_ref[...] * jnp.log(d)


def _intra_kernel(f_ref, lab_1n_ref, lab_n1_ref, z_ref, m_scr, s_scr, *,
                  n_pad, inv_t):
    """Streams over classes c, accumulating sum_c mask_c*G_c into the resident
    output block and the running max / mask-sum into VMEM scratch; the final
    step folds in the `- max_c(G_c) * sum_c mask_c` correction."""
    c = pl.program_id(0)

    @pl.when(c == 0)
    def _init():
        z_ref[...] = jnp.zeros_like(z_ref)
        m_scr[...] = jnp.full_like(m_scr, jnp.float32(-1e30))
        s_scr[...] = jnp.zeros_like(s_scr)

    f = f_ref[...]                                # (n_pad, d_pad) bf16
    g = lax.dot_general(f, f, (((1,), (1,)), ((), ())),
                        preferred_element_type=jnp.float32) * inv_t
    lab_n1 = lab_n1_ref[...]                      # (n_pad, 1)
    lab_1n = lab_1n_ref[0]                        # (1, n_pad)
    ii = lax.broadcasted_iota(jnp.int32, (n_pad, n_pad), 0)
    jj = lax.broadcasted_iota(jnp.int32, (n_pad, n_pad), 1)
    mask_c = jnp.where(ii != jj, lab_n1 * lab_1n, 0.0)

    m_scr[...] = jnp.maximum(m_scr[...], g)       # running max over classes
    s_scr[...] = s_scr[...] + mask_c              # running sum_c mask_c
    z_ref[...] = z_ref[...] + mask_c * g

    @pl.when(c == pl.num_programs(0) - 1)
    def _finalize():
        z_ref[...] = z_ref[...] - m_scr[...] * s_scr[...]


@functools.partial(jax.jit, static_argnames=("temperature", "base_temperature"))
def multi_sup_con_loss(features, labels, temperature=0.2, base_temperature=0.2):
    """features: (B, V, C, D), labels: (B, C) multi-hot (0/1). Returns scalar loss."""
    B, V, C, D = features.shape
    N = B * V
    n_pad = _round_up(N, 16)
    d_pad = _round_up(D, 128)
    cn_pad = C * n_pad
    inv_t = 1.0 / temperature

    # ---- layout plumbing (cheap, O(C*N*D)) --------------------------------
    # class-major features (C, N_pad, D_pad), n = v*B + b, flattened class-major
    f = jnp.transpose(features, (1, 0, 2, 3)).reshape(N, C, D)
    f = jnp.transpose(f, (1, 0, 2))                               # (C, N, D)
    f = jnp.pad(f, ((0, 0), (0, n_pad - N), (0, d_pad - D)))
    f = f.reshape(cn_pad, d_pad).astype(jnp.bfloat16)             # bf16 MXU inputs

    labf = labels.astype(jnp.float32)
    lab_cn = jnp.tile(labf.T, (1, V))                             # (C, N)
    lab_cn = jnp.pad(lab_cn, ((0, 0), (0, n_pad - N)))            # (C, n_pad)
    lab_rowvec = lab_cn.reshape(cn_pad, 1)
    lab_col3 = lab_cn.reshape(C, 1, n_pad)
    valid_1n = (jnp.arange(n_pad) < N).astype(jnp.float32).reshape(1, n_pad)

    rowsum = jnp.sum(lab_cn, axis=1, keepdims=True)               # (C, 1)
    poscnt = lab_cn * (rowsum - lab_cn)                           # positives per anchor
    poscnt_vec = poscnt.reshape(cn_pad, 1)
    s_mask = jnp.sum(poscnt)
    class_nonzero = (jnp.sum(lab_cn, axis=1) > 0).astype(jnp.int32)   # (C,)

    # tile sizes: keep the f32 Gram tile (tr x n_pad) <= ~2 MiB (v7x-safe)
    row_target = 256
    while row_target > 16 and row_target * n_pad * 4 > 2 * 1024 * 1024:
        row_target //= 2
    tr = _pick_row_tile(cn_pad, row_target)
    gr = cn_pad // tr

    # ---- kernel 1: inter / denominator ------------------------------------
    # TODO(synk): for extremely large N (class block > VMEM) the per-class
    # column step would need an additional flash-style running-max split.
    inter_grid = pltpu.PrefetchScalarGridSpec(
        num_scalar_prefetch=1,
        grid=(gr, C),
        in_specs=[
            pl.BlockSpec((tr, d_pad), lambda i, j, cnt: (i, 0)),       # anchor rows
            pl.BlockSpec((n_pad, d_pad), lambda i, j, cnt: (j, 0)),    # contrast cols (1 class)
            pl.BlockSpec((1, 1, n_pad), lambda i, j, cnt: (j, 0, 0)),  # column labels
            pl.BlockSpec((1, n_pad), lambda i, j, cnt: (0, 0)),        # column validity
            pl.BlockSpec((tr, 1), lambda i, j, cnt: (i, 0)),           # row labels
            pl.BlockSpec((tr, 1), lambda i, j, cnt: (i, 0)),           # row positive counts
        ],
        out_specs=pl.BlockSpec((tr, 1), lambda i, j, cnt: (i, 0)),
    )
    inter_rows = pl.pallas_call(
        functools.partial(_inter_kernel, tr=tr, n_pad=n_pad, inv_t=inv_t),
        out_shape=jax.ShapeDtypeStruct((cn_pad, 1), jnp.float32),
        grid_spec=inter_grid,
        compiler_params=pltpu.CompilerParams(
            dimension_semantics=("parallel", "arbitrary"),
            vmem_limit_bytes=48 * 1024 * 1024),
    )(class_nonzero, f, f, lab_col3, valid_1n, lab_rowvec, poscnt_vec)

    # ---- kernel 2: intra term (streamed over classes) ----------------------
    intra_grid = pltpu.PrefetchScalarGridSpec(
        num_scalar_prefetch=0,
        grid=(C,),
        in_specs=[
            pl.BlockSpec((n_pad, d_pad), lambda c: (c, 0)),
            pl.BlockSpec((1, 1, n_pad), lambda c: (c, 0, 0)),
            pl.BlockSpec((n_pad, 1), lambda c: (c, 0)),
        ],
        out_specs=pl.BlockSpec((n_pad, n_pad), lambda c: (0, 0)),
        scratch_shapes=[pltpu.VMEM((n_pad, n_pad), jnp.float32),
                        pltpu.VMEM((n_pad, n_pad), jnp.float32)],
    )
    z = pl.pallas_call(
        functools.partial(_intra_kernel, n_pad=n_pad, inv_t=inv_t),
        out_shape=jax.ShapeDtypeStruct((n_pad, n_pad), jnp.float32),
        grid_spec=intra_grid,
        compiler_params=pltpu.CompilerParams(
            dimension_semantics=("arbitrary",),
            vmem_limit_bytes=48 * 1024 * 1024),
    )(f, lab_col3, lab_rowvec)

    # ---- tiny final combine (O(C*N) work) ----------------------------------
    s_inter = jnp.sum(inter_rows)
    s_intra = jnp.sum(z)
    # the per-row inter term is broadcast over N columns of log_prob -> factor N
    mean_log_prob_pos = (s_intra - jnp.float32(N) * s_inter) / s_mask
    loss = -(temperature / base_temperature) * mean_log_prob_pos / B
    return loss


def multi_sup_con_loss_ref(features, labels, temperature=0.2, base_temperature=0.2):
    """Pure-JAX literal translation of the (fixed) PyTorch forward pass."""
    T, bT = temperature, base_temperature
    B, V, C, D = features.shape
    N = B * V
    labels = labels.astype(jnp.float32)
    cf = jnp.concatenate([features[:, v] for v in range(V)], axis=0)  # (N, C, D)

    labels_t = labels.T                                               # (C, B)
    m = labels_t[:, :, None] * labels_t[:, None, :]                   # (C, B, B)
    mask_intra = jnp.tile(m, (1, V, V)) * (1.0 - jnp.eye(N))          # (C, N, N)

    af = jnp.transpose(cf, (1, 0, 2))                                 # (C, N, D)
    logits_intra = jnp.einsum('cnd,cmd->cnm', af, af) / T
    logits_intra = logits_intra - jnp.max(logits_intra, axis=0, keepdims=True)
    logits_intra = mask_intra * logits_intra

    # TODO(synk): upstream overwrites mask_inter with a shape-incompatible
    # expression; interpreted as excluding the self-similarity diagonal.
    mask_inter = jnp.tile(labels.reshape(-1, 1) * labels.reshape(1, -1), (V, V))
    mask_inter = mask_inter * (1.0 - jnp.eye(N * C))

    all_feat = cf.reshape(N * C, D)
    g = all_feat @ all_feat.T / T
    g = g.reshape(N * C, N, C)
    g = g - jnp.max(g, axis=-2, keepdims=True)
    g = g.reshape(N * C, N * C)
    e = jnp.sum(jnp.exp(g) * mask_inter, axis=1, keepdims=True)
    e = jnp.where(e <= 0.0, 1.0, e)

    # TODO(synk): `all_mask` is undefined in the PyTorch source; interpreted as
    # the per-row positives mask (mask_intra, transposed/reshaped).
    all_mask = jnp.transpose(mask_intra, (1, 0, 2)).reshape(N * C, N)
    logits_inter = all_mask * jnp.log(e)                               # (N*C, N)

    intra_flat = jnp.transpose(mask_intra * logits_intra, (1, 0, 2)).reshape(N * C, N)
    log_prob = intra_flat - jnp.sum(logits_inter, axis=1, keepdims=True)
    mean_log_prob_pos = jnp.sum(log_prob) / jnp.sum(mask_intra)
    loss = -(T / bT) * mean_log_prob_pos
    return loss / B


if __name__ == "__main__":
    key = jax.random.PRNGKey(0)
    B, V, C, D = 2, 2, 4, 32   # batch, n_view, num_classes, dim

    features = jax.random.normal(key, (B, V, C, D), dtype=jnp.float32)
    features = features / jnp.linalg.norm(features, axis=-1, keepdims=True)
    # quantize to bf16-representable values so the bf16 kernel and the f32
    # reference consume numerically identical inputs
    features = features.astype(jnp.bfloat16).astype(jnp.float32)
    labels = jnp.array([[1.0, 0.0, 1.0, 1.0],
                        [0.0, 1.0, 1.0, 0.0]], dtype=jnp.float32)

    loss = multi_sup_con_loss(features, labels)
    loss = jax.block_until_ready(loss)

    ref = multi_sup_con_loss_ref(features, labels)
    if not np.allclose(np.asarray(loss), np.asarray(ref), rtol=5e-3, atol=5e-3):
        raise AssertionError(f"kernel/ref mismatch: kernel={loss}, ref={ref}")

    print("KERNEL_OK")
</pallas_src>

<mosaic_0001>
module attributes {stable_mosaic.version = 11 : i64} {
  func.func @_inter_kernel(%arg0: i32, %arg1: i32, %arg2: memref<4xi32, #tpu.memory_space<smem>>, %arg3: memref<64x128xbf16, #tpu.memory_space<vmem>>, %arg4: memref<16x128xbf16, #tpu.memory_space<vmem>>, %arg5: memref<1x1x16xf32, #tpu.memory_space<vmem>>, %arg6: memref<1x16xf32, #tpu.memory_space<vmem>>, %arg7: memref<64x1xf32, #tpu.memory_space<vmem>>, %arg8: memref<64x1xf32, #tpu.memory_space<vmem>>, %arg9: memref<64x1xf32, #tpu.memory_space<vmem>>) attributes {dimension_semantics = [#tpu.dimension_semantics<parallel>, #tpu.dimension_semantics<arbitrary>], iteration_bounds = array<i64: 1, 4>, scalar_prefetch = 1 : i64, scratch_operands = 0 : i64, tpu.core_type = #tpu.core_type<tc>, window_params = [{transform_indices = @transform_0, window_bounds = array<i64: 64, 128>}, {transform_indices = @transform_1, window_bounds = array<i64: 16, 128>}, {transform_indices = @transform_2, window_bounds = array<i64: 1, 1, 16>}, {pipeline_mode = #tpu.pipeline_mode<synchronous>, transform_indices = @transform_3, window_bounds = array<i64: 1, 16>}, {transform_indices = @transform_4, window_bounds = array<i64: 64, 1>}, {transform_indices = @transform_5, window_bounds = array<i64: 64, 1>}, {transform_indices = @transform_6, window_bounds = array<i64: 64, 1>}]} {
    %c0_i32 = arith.constant 0 : i32
    %0 = arith.cmpi eq, %arg1, %c0_i32 : i32
    %1 = arith.extui %0 : i1 to i32
    %c0_i32_0 = arith.constant 0 : i32
    %2 = arith.cmpi ne, %1, %c0_i32_0 : i32
    scf.if %2 {
      %cst = arith.constant 0.000000e+00 : f32
      %11 = vector.broadcast %cst : f32 to vector<64x1xf32>
      %c0 = arith.constant 0 : index
      %c0_4 = arith.constant 0 : index
      %12 = vector.load %arg9[%c0, %c0_4] : memref<64x1xf32, #tpu.memory_space<vmem>>, vector<64x1xf32>
      tpu.vector_store %arg9[%c0, %c0_4], %11 {strides = array<i32>} : memref<64x1xf32, #tpu.memory_space<vmem>>, vector<64x1xf32>,
    } else {
    }
    %3 = arith.index_cast %arg1 : i32 to index
    %4 = memref.load %arg2[%3] : memref<4xi32, #tpu.memory_space<smem>>
    %c0_i32_1 = arith.constant 0 : i32
    %5 = arith.cmpi sgt, %4, %c0_i32_1 : i32
    %6 = arith.extui %5 : i1 to i32
    %c0_i32_2 = arith.constant 0 : i32
    %7 = arith.cmpi ne, %6, %c0_i32_2 : i32
    scf.if %7 {
      %c0 = arith.constant 0 : index
      %c0_4 = arith.constant 0 : index
      %11 = vector.load %arg3[%c0, %c0_4] : memref<64x128xbf16, #tpu.memory_space<vmem>>, vector<64x128xbf16>
      %c0_5 = arith.constant 0 : index
      %c0_6 = arith.constant 0 : index
      %12 = vector.load %arg4[%c0_5, %c0_6] : memref<16x128xbf16, #tpu.memory_space<vmem>>, vector<16x128xbf16>
      %cst = arith.constant dense<0.000000e+00> : vector<64x16xf32>
      %13 = tpu.matmul %11, %12, %cst {dimension_numbers = #tpu.dot_dimension_numbers<[1], [1], [0], [0], [0, 0, 1, 0], [], []>} : vector<64x128xbf16>, vector<16x128xbf16>, vector<64x16xf32> -> vector<64x16xf32>
      %cst_7 = arith.constant 5.000000e+00 : f32
      %14 = vector.broadcast %cst_7 : f32 to vector<64x16xf32>
      %15 = arith.mulf %13, %14 : vector<64x16xf32>
      %c0_8 = arith.constant 0 : index
      %c0_9 = arith.constant 0 : index
      %16 = vector.load %arg6[%c0_8, %c0_9] : memref<1x16xf32, #tpu.memory_space<vmem>>, vector<1x16xf32>
      %c0_10 = arith.constant 0 : index
      %c0_11 = arith.constant 0 : index
      %c0_12 = arith.constant 0 : index
      %17 = vector.load %arg5[%c0_10, %c0_11, %c0_12] : memref<1x1x16xf32, #tpu.memory_space<vmem>>, vector<1x1x16xf32>
      %18 = vector.shape_cast %17 : vector<1x1x16xf32> to vector<1x16xf32>
      %cst_13 = arith.constant 5.000000e-01 : f32
      %19 = vector.broadcast %cst_13 : f32 to vector<1x16xf32>
      %20 = arith.cmpf ogt, %16, %19 : vector<1x16xf32>
      %cst_14 = arith.constant -1.000000e+30 : f32
      %21 = vector.shape_cast %20 : vector<1x16xi1> to vector<1x16xi1>
      %22 = vector.broadcast %21 : vector<1x16xi1> to vector<64x16xi1>
      %23 = vector.broadcast %cst_14 : f32 to vector<64x16xf32>
      %24 = arith.select %22, %15, %23 : vector<64x16xi1>, vector<64x16xf32>
      %cst_15 = arith.constant dense<0xFF800000> : vector<64xf32>
      %25 = vector.multi_reduction <maximumf>, %24, %cst_15 [1] : vector<64x16xf32> to vector<64xf32>
      %26 = vector.shape_cast %25 : vector<64xf32> to vector<64x1xf32>
      %cst_16 = arith.constant 5.000000e-01 : f32
      %27 = vector.broadcast %cst_16 : f32 to vector<1x16xf32>
      %28 = arith.cmpf ogt, %16, %27 : vector<1x16xf32>
      %29 = vector.broadcast %26 : vector<64x1xf32> to vector<64x16xf32>
      %30 = arith.subf %15, %29 : vector<64x16xf32>
      %cst_17 = arith.constant 0.000000e+00 : f32
      %31 = vector.shape_cast %28 : vector<1x16xi1> to vector<1x16xi1>
      %32 = vector.broadcast %31 : vector<1x16xi1> to vector<64x16xi1>
      %33 = vector.broadcast %cst_17 : f32 to vector<64x16xf32>
      %34 = arith.select %32, %30, %33 : vector<64x16xi1>, vector<64x16xf32>
      %35 = math.exp %34 : vector<64x16xf32>
      %c64_i32 = arith.constant 64 : i32
      %36 = arith.muli %arg0, %c64_i32 : i32
      %37 = tpu.iota {dimensions = array<i32: 0>} : vector<64x16xi32>
      %38 = vector.broadcast %36 : i32 to vector<64x16xi32>
      %39 = arith.addi %38, %37 : vector<64x16xi32>
      %c16_i32 = arith.constant 16 : i32
      %40 = arith.muli %arg1, %c16_i32 : i32
      %41 = tpu.iota {dimensions = array<i32: 1>} : vector<64x16xi32>
      %42 = vector.broadcast %40 : i32 to vector<64x16xi32>
      %43 = arith.addi %42, %41 : vector<64x16xi32>
      %44 = arith.cmpi ne, %39, %43 : vector<64x16xi32>
      %45 = vector.broadcast %18 : vector<1x16xf32> to vector<64x16xf32>
      %46 = arith.mulf %35, %45 : vector<64x16xf32>
      %cst_18 = arith.constant 0.000000e+00 : f32
      %47 = vector.broadcast %cst_18 : f32 to vector<64x16xf32>
      %48 = arith.select %44, %46, %47 : vector<64x16xi1>, vector<64x16xf32>
      %cst_19 = arith.constant dense<0.000000e+00> : vector<64xf32>
      %49 = vector.multi_reduction <add>, %48, %cst_19 [1] : vector<64x16xf32> to vector<64xf32>
      %50 = vector.shape_cast %49 : vector<64xf32> to vector<64x1xf32>
      %c0_20 = arith.constant 0 : index
      %c0_21 = arith.constant 0 : index
      %51 = vector.load %arg9[%c0_20, %c0_21] : memref<64x1xf32, #tpu.memory_space<vmem>>, vector<64x1xf32>
      %c0_22 = arith.constant 0 : index
      %c0_23 = arith.constant 0 : index
      %52 = vector.load %arg7[%c0_22, %c0_23] : memref<64x1xf32, #tpu.memory_space<vmem>>, vector<64x1xf32>
      %53 = arith.mulf %52, %50 : vector<64x1xf32>
      %54 = arith.addf %51, %53 : vector<64x1xf32>
      %c0_24 = arith.constant 0 : index
      %c0_25 = arith.constant 0 : index
      %55 = vector.load %arg9[%c0_24, %c0_25] : memref<64x1xf32, #tpu.memory_space<vmem>>, vector<64x1xf32>
      tpu.vector_store %arg9[%c0_24, %c0_25], %54 {strides = array<i32>} : memref<64x1xf32, #tpu.memory_space<vmem>>, vector<64x1xf32>,
    } else {
    }
    %c3_i32 = arith.constant 3 : i32
    %8 = arith.cmpi eq, %arg1, %c3_i32 : i32
    %9 = arith.extui %8 : i1 to i32
    %c0_i32_3 = arith.constant 0 : i32
    %10 = arith.cmpi ne, %9, %c0_i32_3 : i32
    scf.if %10 {
      %c0 = arith.constant 0 : index
      %c0_4 = arith.constant 0 : index
      %11 = vector.load %arg9[%c0, %c0_4] : memref<64x1xf32, #tpu.memory_space<vmem>>, vector<64x1xf32>
      %cst = arith.constant 0.000000e+00 : f32
      %12 = vector.broadcast %cst : f32 to vector<64x1xf32>
      %13 = arith.cmpf ole, %11, %12 : vector<64x1xf32>
      %cst_5 = arith.constant 1.000000e+00 : f32
      %14 = vector.broadcast %cst_5 : f32 to vector<64x1xf32>
      %15 = arith.select %13, %14, %11 : vector<64x1xi1>, vector<64x1xf32>
      %c0_6 = arith.constant 0 : index
      %c0_7 = arith.constant 0 : index
      %16 = vector.load %arg8[%c0_6, %c0_7] : memref<64x1xf32, #tpu.memory_space<vmem>>, vector<64x1xf32>
      %17 = math.log %15 : vector<64x1xf32>
      %18 = arith.mulf %16, %17 : vector<64x1xf32>
      %c0_8 = arith.constant 0 : index
      %c0_9 = arith.constant 0 : index
      %19 = vector.load %arg9[%c0_8, %c0_9] : memref<64x1xf32, #tpu.memory_space<vmem>>, vector<64x1xf32>
      tpu.vector_store %arg9[%c0_8, %c0_9], %18 {strides = array<i32>} : memref<64x1xf32, #tpu.memory_space<vmem>>, vector<64x1xf32>,
    } else {
    }
    return
  }
  func.func @transform_0(%arg0: i32, %arg1: i32, %arg2: memref<4xi32, #tpu.memory_space<smem>>) -> (i32, i32) {
    %c0_i32 = arith.constant 0 : i32
    %c0_i32_0 = arith.constant 0 : i32
    return %arg0, %c0_i32 : i32, i32
  }
  func.func @transform_1(%arg0: i32, %arg1: i32, %arg2: memref<4xi32, #tpu.memory_space<smem>>) -> (i32, i32) {
    %c0_i32 = arith.constant 0 : i32
    %c0_i32_0 = arith.constant 0 : i32
    return %arg1, %c0_i32 : i32, i32
  }
  func.func @transform_2(%arg0: i32, %arg1: i32, %arg2: memref<4xi32, #tpu.memory_space<smem>>) -> (i32, i32, i32) {
    %c0_i32 = arith.constant 0 : i32
    %c0_i32_0 = arith.constant 0 : i32
    %c0_i32_1 = arith.constant 0 : i32
    return %arg1, %c0_i32, %c0_i32_0 : i32, i32, i32
  }
  func.func @transform_3(%arg0: i32, %arg1: i32, %arg2: memref<4xi32, #tpu.memory_space<smem>>) -> (i32, i32) {
    %c0_i32 = arith.constant 0 : i32
    %c0_i32_0 = arith.constant 0 : i32
    %c0_i32_1 = arith.constant 0 : i32
    return %c0_i32, %c0_i32_0 : i32, i32
  }
  func.func @transform_4(%arg0: i32, %arg1: i32, %arg2: memref<4xi32, #tpu.memory_space<smem>>) -> (i32, i32) {
    %c0_i32 = arith.constant 0 : i32
    %c0_i32_0 = arith.constant 0 : i32
    return %arg0, %c0_i32 : i32, i32
  }
  func.func @transform_5(%arg0: i32, %arg1: i32, %arg2: memref<4xi32, #tpu.memory_space<smem>>) -> (i32, i32) {
    %c0_i32 = arith.constant 0 : i32
    %c0_i32_0 = arith.constant 0 : i32
    return %arg0, %c0_i32 : i32, i32
  }
  func.func @transform_6(%arg0: i32, %arg1: i32, %arg2: memref<4xi32, #tpu.memory_space<smem>>) -> (i32, i32) {
    %c0_i32 = arith.constant 0 : i32
    %c0_i32_0 = arith.constant 0 : i32
    return %arg0, %c0_i32 : i32, i32
  }
}

module attributes {stable_mosaic.version = 11 : i64} {
  func.func @_intra_kernel(%arg0: i32, %arg1: memref<16x128xbf16, #tpu.memory_space<vmem>>, %arg2: memref<1x1x16xf32, #tpu.memory_space<vmem>>, %arg3: memref<16x1xf32, #tpu.memory_space<vmem>>, %arg4: memref<16x16xf32, #tpu.memory_space<vmem>>, %arg5: memref<16x16xf32, #tpu.memory_space<vmem>>, %arg6: memref<16x16xf32, #tpu.memory_space<vmem>>) attributes {dimension_semantics = [#tpu.dimension_semantics<arbitrary>], iteration_bounds = array<i64: 4>, scalar_prefetch = 0 : i64, scratch_operands = 2 : i64, tpu.core_type = #tpu.core_type<tc>, window_params = [{transform_indices = @transform_0, window_bounds = array<i64: 16, 128>}, {transform_indices = @transform_1, window_bounds = array<i64: 1, 1, 16>}, {transform_indices = @transform_2, window_bounds = array<i64: 16, 1>}, {pipeline_mode = #tpu.pipeline_mode<synchronous>, transform_indices = @transform_3, window_bounds = array<i64: 16, 16>}]} {
    %c0_i32 = arith.constant 0 : i32
    %0 = arith.cmpi eq, %arg0, %c0_i32 : i32
    %1 = arith.extui %0 : i1 to i32
    %c0_i32_0 = arith.constant 0 : i32
    %2 = arith.cmpi ne, %1, %c0_i32_0 : i32
    scf.if %2 {
      %cst_22 = arith.constant 0.000000e+00 : f32
      %31 = vector.broadcast %cst_22 : f32 to vector<16x16xf32>
      %c0_23 = arith.constant 0 : index
      %c0_24 = arith.constant 0 : index
      %32 = vector.load %arg4[%c0_23, %c0_24] : memref<16x16xf32, #tpu.memory_space<vmem>>, vector<16x16xf32>
      tpu.vector_store %arg4[%c0_23, %c0_24], %31 {strides = array<i32>} : memref<16x16xf32, #tpu.memory_space<vmem>>, vector<16x16xf32>,
      %cst_25 = arith.constant -1.000000e+30 : f32
      %33 = vector.broadcast %cst_25 : f32 to vector<16x16xf32>
      %c0_26 = arith.constant 0 : index
      %c0_27 = arith.constant 0 : index
      %34 = vector.load %arg5[%c0_26, %c0_27] : memref<16x16xf32, #tpu.memory_space<vmem>>, vector<16x16xf32>
      tpu.vector_store %arg5[%c0_26, %c0_27], %33 {strides = array<i32>} : memref<16x16xf32, #tpu.memory_space<vmem>>, vector<16x16xf32>,
      %cst_28 = arith.constant 0.000000e+00 : f32
      %35 = vector.broadcast %cst_28 : f32 to vector<16x16xf32>
      %c0_29 = arith.constant 0 : index
      %c0_30 = arith.constant 0 : index
      %36 = vector.load %arg6[%c0_29, %c0_30] : memref<16x16xf32, #tpu.memory_space<vmem>>, vector<16x16xf32>
      tpu.vector_store %arg6[%c0_29, %c0_30], %35 {strides = array<i32>} : memref<16x16xf32, #tpu.memory_space<vmem>>, vector<16x16xf32>,
    } else {
    }
    %c0 = arith.constant 0 : index
    %c0_1 = arith.constant 0 : index
    %3 = vector.load %arg1[%c0, %c0_1] : memref<16x128xbf16, #tpu.memory_space<vmem>>, vector<16x128xbf16>
    %cst = arith.constant dense<0.000000e+00> : vector<16x16xf32>
    %4 = tpu.matmul %3, %3, %cst {dimension_numbers = #tpu.dot_dimension_numbers<[1], [1], [0], [0], [0, 0, 1, 0], [], []>} : vector<16x128xbf16>, vector<16x128xbf16>, vector<16x16xf32> -> vector<16x16xf32>
    %cst_2 = arith.constant 5.000000e+00 : f32
    %5 = vector.broadcast %cst_2 : f32 to vector<16x16xf32>
    %6 = arith.mulf %4, %5 : vector<16x16xf32>
    %c0_3 = arith.constant 0 : index
    %c0_4 = arith.constant 0 : index
    %7 = vector.load %arg3[%c0_3, %c0_4] : memref<16x1xf32, #tpu.memory_space<vmem>>, vector<16x1xf32>
    %c0_5 = arith.constant 0 : index
    %c0_6 = arith.constant 0 : index
    %c0_7 = arith.constant 0 : index
    %8 = vector.load %arg2[%c0_5, %c0_6, %c0_7] : memref<1x1x16xf32, #tpu.memory_space<vmem>>, vector<1x1x16xf32>
    %9 = vector.shape_cast %8 : vector<1x1x16xf32> to vector<1x16xf32>
    %10 = tpu.iota {dimensions = array<i32: 0>} : vector<16x16xi32>
    %11 = tpu.iota {dimensions = array<i32: 1>} : vector<16x16xi32>
    %12 = arith.cmpi ne, %10, %11 : vector<16x16xi32>
    %13 = vector.broadcast %7 : vector<16x1xf32> to vector<16x16xf32>
    %14 = vector.broadcast %9 : vector<1x16xf32> to vector<16x16xf32>
    %15 = arith.mulf %13, %14 : vector<16x16xf32>
    %cst_8 = arith.constant 0.000000e+00 : f32
    %16 = vector.broadcast %cst_8 : f32 to vector<16x16xf32>
    %17 = arith.select %12, %15, %16 : vector<16x16xi1>, vector<16x16xf32>
    %c0_9 = arith.constant 0 : index
    %c0_10 = arith.constant 0 : index
    %18 = vector.load %arg5[%c0_9, %c0_10] : memref<16x16xf32, #tpu.memory_space<vmem>>, vector<16x16xf32>
    %19 = arith.maximumf %18, %6 : vector<16x16xf32>
    %c0_11 = arith.constant 0 : index
    %c0_12 = arith.constant 0 : index
    %20 = vector.load %arg5[%c0_11, %c0_12] : memref<16x16xf32, #tpu.memory_space<vmem>>, vector<16x16xf32>
    tpu.vector_store %arg5[%c0_11, %c0_12], %19 {strides = array<i32>} : memref<16x16xf32, #tpu.memory_space<vmem>>, vector<16x16xf32>,
    %c0_13 = arith.constant 0 : index
    %c0_14 = arith.constant 0 : index
    %21 = vector.load %arg6[%c0_13, %c0_14] : memref<16x16xf32, #tpu.memory_space<vmem>>, vector<16x16xf32>
    %22 = arith.addf %21, %17 : vector<16x16xf32>
    %c0_15 = arith.constant 0 : index
    %c0_16 = arith.constant 0 : index
    %23 = vector.load %arg6[%c0_15, %c0_16] : memref<16x16xf32, #tpu.memory_space<vmem>>, vector<16x16xf32>
    tpu.vector_store %arg6[%c0_15, %c0_16], %22 {strides = array<i32>} : memref<16x16xf32, #tpu.memory_space<vmem>>, vector<16x16xf32>,
    %c0_17 = arith.constant 0 : index
    %c0_18 = arith.constant 0 : index
    %24 = vector.load %arg4[%c0_17, %c0_18] : memref<16x16xf32, #tpu.memory_space<vmem>>, vector<16x16xf32>
    %25 = arith.mulf %17, %6 : vector<16x16xf32>
    %26 = arith.addf %24, %25 : vector<16x16xf32>
    %c0_19 = arith.constant 0 : index
    %c0_20 = arith.constant 0 : index
    %27 = vector.load %arg4[%c0_19, %c0_20] : memref<16x16xf32, #tpu.memory_space<vmem>>, vector<16x16xf32>
    tpu.vector_store %arg4[%c0_19, %c0_20], %26 {strides = array<i32>} : memref<16x16xf32, #tpu.memory_space<vmem>>, vector<16x16xf32>,
    %c3_i32 = arith.constant 3 : i32
    %28 = arith.cmpi eq, %arg0, %c3_i32 : i32
    %29 = arith.extui %28 : i1 to i32
    %c0_i32_21 = arith.constant 0 : i32
    %30 = arith.cmpi ne, %29, %c0_i32_21 : i32
    scf.if %30 {
      %c0_22 = arith.constant 0 : index
      %c0_23 = arith.constant 0 : index
      %31 = vector.load %arg4[%c0_22, %c0_23] : memref<16x16xf32, #tpu.memory_space<vmem>>, vector<16x16xf32>
      %c0_24 = arith.constant 0 : index
      %c0_25 = arith.constant 0 : index
      %32 = vector.load %arg5[%c0_24, %c0_25] : memref<16x16xf32, #tpu.memory_space<vmem>>, vector<16x16xf32>
      %c0_26 = arith.constant 0 : index
      %c0_27 = arith.constant 0 : index
      %33 = vector.load %arg6[%c0_26, %c0_27] : memref<16x16xf32, #tpu.memory_space<vmem>>, vector<16x16xf32>
      %34 = arith.mulf %32, %33 : vector<16x16xf32>
      %35 = arith.subf %31, %34 : vector<16x16xf32>
      %c0_28 = arith.constant 0 : index
      %c0_29 = arith.constant 0 : index
      %36 = vector.load %arg4[%c0_28, %c0_29] : memref<16x16xf32, #tpu.memory_space<vmem>>, vector<16x16xf32>
      tpu.vector_store %arg4[%c0_28, %c0_29], %35 {strides = array<i32>} : memref<16x16xf32, #tpu.memory_space<vmem>>, vector<16x16xf32>,
    } else {
    }
    return
  }
  func.func @transform_0(%arg0: i32) -> (i32, i32) {
    %c0_i32 = arith.constant 0 : i32
    %c0_i32_0 = arith.constant 0 : i32
    return %arg0, %c0_i32 : i32, i32
  }
  func.func @transform_1(%arg0: i32) -> (i32, i32, i32) {
    %c0_i32 = arith.constant 0 : i32
    %c0_i32_0 = arith.constant 0 : i32
    %c0_i32_1 = arith.constant 0 : i32
    return %arg0, %c0_i32, %c0_i32_0 : i32, i32, i32
  }
  func.func @transform_2(%arg0: i32) -> (i32, i32) {
    %c0_i32 = arith.constant 0 : i32
    %c0_i32_0 = arith.constant 0 : i32
    return %arg0, %c0_i32 : i32, i32
  }
  func.func @transform_3(%arg0: i32) -> (i32, i32) {
    %c0_i32 = arith.constant 0 : i32
    %c0_i32_0 = arith.constant 0 : i32
    %c0_i32_1 = arith.constant 0 : i32
    return %c0_i32, %c0_i32_0 : i32, i32
  }
}

</mosaic_0001>

<bundles_post_ra>
// kernel: multi_sup_con_loss.3
= control target key start
LH: loop header
LB: loop body
LE: loop exit
PB: predicated region body
PF: predicated region fallthrough
CT: control target
= control target key end

     0   :  { %s404_s12 = smov 0   ;;  %s472_s0 = inlined_call_operand.vmem [shape: bf16[64,128], index: 0, kind: input, shape index: {}]   ;;  %s473_s1 = inlined_call_operand.vmem [shape: f32[4,1,16], index: 1, kind: input, shape index: {}]   ;;  %s474_s2 = inlined_call_operand.vmem [shape: f32[64,1], index: 2, kind: input, shape index: {}]   ;;  %s475_s3 = inlined_call_operand.vmem [shape: f32[16,16], index: 3, kind: output, shape index: {}]  }
   0x1 LB: > { %s410_s13 = sadd.s32 4294967295, %s379_s12   ;;  %p346_p0 = scmp.ge.s32.totalorder %s379_s12, 1  ;;  %s379_s12 = sphi %s404_s12, %s13_s12  }
   0x2   : > { %p152_p1 = scmp.lt.s32.totalorder %s379_s12, 5 }
   0x4   : > { %p153_p2 = pnand %p346_p0, %p152_p1 }
   0x5   : > { %s347_s14 = sshll.u32 (!%p153_p2), %s410_s13, 1  ;;  %p185_p3 = scmp.lt.s32.totalorder (!%p153_p2), %s410_s13, 3 }
   0x6   : > { %156 = sbr.rel (%p153_p2) target bundleno = 183 (0xb7), region = 32  ;;  %p180_p4 = scmp.lt.s32.totalorder (!%p153_p2), %s347_s14, 7 }
   0x7   : > { %p351_p5 = scmp.ne.s32.totalorder (!%p153_p2), %s410_s13, 0 }
   0xb   : > { %s417_s15 = scalar_select %p185_p3, %s410_s13, 3 }
   0xc   : > { %s477_s14 = smov (!%p180_p4, %s347_s14), 7  ;;  %198 = sbr.rel (%p351_p5) target bundleno = 24 (0x18), region = 36 }
   0xd   : > { %s187_s18 = scalar_lea.vmem %s473_s1, %s417_s15  ;;  %s348_s19 = sshll.u32 %s477_s14, 2 }
   0xe   : > { %s350_s20 = sshll.u32 %s477_s14, 3  ;;  %s183_s23 = scalar_lea.vmem %s472_s0, %s348_s19 }
   0xf   : > { %s192_s26 = scalar_lea.vmem %s474_s2, %s350_s20 }
  0x11   : > { %vm199_vm0 = vcmask 130048   ;;  %v381_v0 = vmov 0.0   ;;  %v382_v1 = vmov -1e+30  }
  0x12   : > { %200 = vst.msk [vmem:[%s475_s3] sm:$0xff] %vm199_vm0, %v381_v0 }
  0x13   : > { %201 = vst.msk [vmem:[%s475_s3 + $0x8] sm:$0xff] %vm199_vm0, %v381_v0 }
  0x14   : > { %204 = vst.msk [vmem:[#allocation3] sm:$0xff] %vm199_vm0, %v381_v0 }
  0x15   : > { %205 = vst.msk [vmem:[#allocation3 + $0x8] sm:$0xff] %vm199_vm0, %v381_v0 }
  0x16   : > { %202 = vst.msk [vmem:[#allocation2] sm:$0xff] %vm199_vm0, %v382_v1 }
  0x17   : > { %203 = vst.msk [vmem:[#allocation2 + $0x8] sm:$0xff] %vm199_vm0, %v382_v1 }
  0x18 PF: > { %v359_v2 = vld [vmem:[%s183_s23] sm:$0xff]  ;;  %v383_v4 = vmov 0   ;;  %v231_v5 = vld [vmem:[%s192_s26 + $0x8] sm:$0xff]  ;;  %v233_v6 = vlaneseq  ;;  %vm261_vm2 = vcmask 130048   ;;  %p356_p6 = scmp.ne.s32.totalorder %s410_s13, 3 }
  0x19   : > { %v230_v3 = vld [vmem:[%s192_s26] sm:$0xff]  ;;  %371 = vset.pattern.permute.xlu0 %v383_v4  ;;  %221 = vmatpush.bf16.xpose.msra.mxu0 %v359_v2 }
  0x1a   : > { %242 = vperm.xlu0 %371, %v230_v3   ;;  %v237_v7 = vand.u32 127, %v233_v6  ;;  %v372_v8 = vld [vmem:[%s187_s18] ss:$0 sm:$0xff]  ;;  %v234_v9 = vshrl.u32 %v233_v6, 7  ;;  %v271_v31 = vld [vmem:[%s475_s3 + $0x8] sm:$0xff] }
  0x1b   : > { %v264_v11 = vld [vmem:[#allocation3] sm:$0xff]  ;;  %v270_v24 = vld [vmem:[%s475_s3] sm:$0xff] }
  0x1c   : > { %vm238_vm1 = vcmp.ne.s32.totalorder %v234_v9, %v237_v7  ;;  %v235_v15 = vadd.s32 8, %v234_v9  ;;  %v265_v17 = vld [vmem:[#allocation3 + $0x8] sm:$0xff] }
  0x1d   : > { %v257_v22 = vld [vmem:[#allocation2] sm:$0xff] }
  0x1e   : > { %vm239_vm3 = vcmp.ne.s32.totalorder %v235_v15, %v237_v7  ;;  %v258_v29 = vld [vmem:[#allocation2 + $0x8] sm:$0xff] }
  0x20   : > { %222 = vmatmul.bf16.vlgmr.msra.gmra.mxu0 %v359_v2 }
  0x22   : > { %247 = vperm.xlu0 %371, %v231_v5  }
  0x8c   : > { %v243_v10 = vpop.permute.xlu0 %242 }
  0x8d   : > { %v253_v12 = vmul.f32 %v372_v8, %v243_v10 }
  0x8f   : > { %v255_v13 = vsel %vm238_vm1, %v253_v12, 0.0 }
  0x90   : > { %v266_v14 = vadd.f32 %v264_v11, %v255_v13 }
  0x92   : > { %268 = vst.msk [vmem:[#allocation3] sm:$0xff] %vm261_vm2, %v266_v14 }
  0x94   : > { %v248_v16 = vpop.permute.xlu0 %247 }
  0x95   : > { %v254_v18 = vmul.f32 %v372_v8, %v248_v16 }
  0x97   : > { %v256_v19 = vsel %vm239_vm3, %v254_v18, 0.0 }
  0x98   : > { %v267_v20 = vadd.f32 %v265_v17, %v256_v19 }
  0x9a   : > { %269 = vst.msk [vmem:[#allocation3 + $0x8] sm:$0xff] %vm261_vm2, %v267_v20 }
  0x9d   : > { %v223_v21 = vpop.f32.mrf.mxu0 }
  0x9e   : > { %v228_v23 = vmul.f32 5.0, %v223_v21 }
  0xa0   : > { %v259_v25 = vmax.f32 %v257_v22, %v228_v23  ;;  %v272_v26 = vmul.f32 %v255_v13, %v228_v23 }
  0xa2   : > { %262 = vst.msk [vmem:[#allocation2] sm:$0xff] %vm261_vm2, %v259_v25  ;;  %v274_v27 = vadd.f32 %v272_v26, %v270_v24 }
  0xa4   : > { %276 = vst.msk [vmem:[%s475_s3] sm:$0xff] %vm261_vm2, %v274_v27 }
  0xa5   : > { %v225_v28 = vpop.f32.mrf.mxu0 }
  0xa6   : > { %v229_v30 = vmul.f32 5.0, %v225_v28 }
  0xa8   : > { %v260_v32 = vmax.f32 %v258_v29, %v229_v30  ;;  %v273_v33 = vmul.f32 %v256_v19, %v229_v30  ;;  %281 = sbr.rel (%p356_p6) target bundleno = 183 (0xb7), region = 40 }
  0xaa   : > { %263 = vst.msk [vmem:[#allocation2 + $0x8] sm:$0xff] %vm261_vm2, %v260_v32  ;;  %v275_v34 = vadd.f32 %v273_v33, %v271_v31 }
  0xac   : > { %277 = vst.msk [vmem:[%s475_s3 + $0x8] sm:$0xff] %vm261_vm2, %v275_v34 }
  0xad   : > { %v282_v35 = vld [vmem:[%s475_s3] sm:$0xff]  ;;  %v286_v37 = vld [vmem:[#allocation3] sm:$0xff]  ;;  %v287_v41 = vld [vmem:[#allocation3 + $0x8] sm:$0xff] }
  0xae   : > { %v284_v36 = vld [vmem:[#allocation2] sm:$0xff] }
  0xaf   : > { %v288_v38 = vmul.f32 %v286_v37, %v284_v36 }
  0xb1   : > { %v285_v40 = vld [vmem:[#allocation2 + $0x8] sm:$0xff]  ;;  %v290_v43 = vsub.f32 %v282_v35, %v288_v38 }
  0xb2   : > { %v289_v42 = vmul.f32 %v287_v41, %v285_v40 }
  0xb3   : > { %v283_v39 = vld [vmem:[%s475_s3 + $0x8] sm:$0xff]  ;;  %292 = vst.msk [vmem:[%s475_s3] sm:$0xff] %vm261_vm2, %v290_v43 }
  0xb4   : > { %v291_v44 = vsub.f32 %v283_v39, %v289_v42 }
  0xb6   : > { %293 = vst.msk [vmem:[%s475_s3 + $0x8] sm:$0xff] %vm261_vm2, %v291_v44 }
  0xb7 PF: > { %s13_s12 = sadd.s32 1, %s379_s12  }
  0xb8   : > { %p10_p7 = scmp.ge.s32.totalorder %s13_s12, 6  }
  0xba   :  { %12 = sbr.rel (!%p10_p7) target bundleno = 1 (0x1), region = 72 }

// kernel: multi_sup_con_loss.2
= control target key start
LH: loop header
LB: loop body
LE: loop exit
PB: predicated region body
PF: predicated region fallthrough
CT: control target
= control target key end

     0   :  { %s967_s27 = smov [#allocation3]   ;;  %s1356_s0 = inlined_call_operand.vmem [shape: s32[4], index: 0, kind: input, shape index: {}]   ;;  %s1357_s1 = inlined_call_operand.vmem [shape: bf16[64,128], index: 1, kind: input, shape index: {}, may-alias: {1,2}]   ;;  %s1358_s2 = inlined_call_operand.vmem [shape: bf16[64,128], index: 2, kind: input, shape index: {}, may-alias: {1,2}]   ;;  %s1359_s3 = inlined_call_operand.vmem [shape: f32[4,1,16], index: 3, kind: input, shape index: {}]   ;;  %s1360_s4 = inlined_call_operand.vmem [shape: f32[1,16], index: 4, kind: input, shape index: {}]   ;;  %s1361_s5 = inlined_call_operand.vmem [shape: f32[64,1], index: 5, kind: input, shape index: {}]   ;;  %s1362_s6 = inlined_call_operand.vmem [shape: f32[64,1], index: 6, kind: input, shape index: {}]   ;;  %s1363_s7 = inlined_call_operand.vmem [shape: f32[64,1], index: 7, kind: output, shape index: {}]  }
   0x1   :  { %s13_s26 = sshll.u32 %s1356_s0, 4  ;;  %s14_s26 = int_to_ptr.vmem [resolvable:$true] %s13_s26 }
   0x2   :  { %16 = dma.vmem_to_smem %s14_s26, 16, %s967_s27, [#allocation2] }
   0x3   :  { %953 = dma.done.wait [#allocation2], 16 }
   0x4   :  { %954 = vsyncadd [#allocation2], 4294967280 }
   0x5   :  { %19 = sfence }
   0x6   :  { %s1013_s28 = smov 0   ;;  %s1015_s29 = smov 0  }
   0x7   :  { %s1017_s30 = smov 0  }
   0x8 LB: > { %s34_s0 = sadd.s32 1, %s961_s29  ;;  %p830_p0 = scmp.ge.s32.totalorder %s965_s30, 1  ;;  %s965_s30 = sphi %s1017_s30, %s25_s30   ;;  %s961_s29 = sphi %s1015_s29, %s1367_s29   ;;  %s957_s28 = sphi %s1013_s28, %s1366_s28  }
   0x9   : > { %p35_p1 = scmp.ge.s32.totalorder %s34_s0, 4  ;;  %p275_p2 = scmp.lt.s32.totalorder %s965_s30, 5 }
   0xb   : > { %s1369_s0 = smov (%p35_p1, %s34_s0), 0  ;;  %p276_p3 = pnand %p830_p0, %p275_p2 }
   0xc   : > { %s831_s8 = sshll.u32 (!%p276_p3), %s957_s28, 1  ;;  %p335_p4 = scmp.lt.s32.totalorder (!%p276_p3), %s957_s28, 3 }
   0xd   : > { %279 = sbr.rel (%p276_p3) target bundleno = 489 (0x1e9), region = 44  ;;  %p330_p5 = scmp.lt.s32.totalorder (!%p276_p3), %s831_s8, 7 }
   0xe   : > { %p833_p6 = scmp.ne.s32.totalorder (!%p276_p3), %s957_s28, 0 }
  0x12   : > { %s1036_s9 = scalar_select %p335_p4, %s957_s28, 3 }
  0x13   : > { %s1371_s8 = smov (!%p330_p5, %s831_s8), 7  ;;  %360 = sbr.rel (%p833_p6) target bundleno = 33 (0x21), region = 48 }
  0x14   : > { %s337_s12 = scalar_lea.vmem %s1359_s3, %s1036_s9  ;;  %s832_s13 = sshll.u32 %s1371_s8, 2 }
  0x15   : > { %s333_s16 = scalar_lea.vmem %s1358_s2, %s832_s13 }
  0x18   : > { %vm361_vm0 = vcmask 7168   ;;  %v968_v0 = vmov 0.0  }
  0x19   : > { %362 = vst.msk [vmem:[%s1363_s7] sm:$0xff] %vm361_vm0, %v968_v0 }
  0x1a   : > { %363 = vst.msk [vmem:[%s1363_s7 + $0x8] sm:$0xff] %vm361_vm0, %v968_v0 }
  0x1b   : > { %364 = vst.msk [vmem:[%s1363_s7 + $0x10] sm:$0xff] %vm361_vm0, %v968_v0 }
  0x1c   : > { %365 = vst.msk [vmem:[%s1363_s7 + $0x18] sm:$0xff] %vm361_vm0, %v968_v0 }
  0x1d   : > { %366 = vst.msk [vmem:[%s1363_s7 + $0x20] sm:$0xff] %vm361_vm0, %v968_v0 }
  0x1e   : > { %367 = vst.msk [vmem:[%s1363_s7 + $0x28] sm:$0xff] %vm361_vm0, %v968_v0 }
  0x1f   : > { %368 = vst.msk [vmem:[%s1363_s7 + $0x30] sm:$0xff] %vm361_vm0, %v968_v0 }
  0x20   : > { %369 = vst.msk [vmem:[%s1363_s7 + $0x38] sm:$0xff] %vm361_vm0, %v968_v0 }
  0x21 PF: > { %s370_s15 = sld [smem:[#allocation3 + %s957_s28]] }
  0x27   : > { %p834_p7 = scmp.le.s32.totalorder %s370_s15, 0 }
  0x28   : > { %s855_s26 = sshll.u32 (!%p834_p7), %s957_s28, 4 }
  0x29   : > { %374 = sbr.rel (%p834_p7) target bundleno = 460 (0x1cc), region = 52 }
  0x2e   : > { %v865_v1 = vld [vmem:[%s333_s16] sm:$0xff]  ;;  %v862_v3 = vld [vmem:[%s1357_s1 + $0x8] sm:$0xff]  ;;  %v863_v4 = vld [vmem:[%s1357_s1 + $0x10] sm:$0xff]  ;;  %v969_v7 = vmov 0   ;;  %vm466_vm3 = vcmask 130048   ;;  %v524_v45 = vlaneseq  ;;  %v545_v54 = vstv %s855_s26 }
  0x2f   : > { %422 = vmatpush.bf16.xpose.msra.mxu0 %v865_v1  ;;  %866 = vmatpush.bf16.xpose.msra.mxu1 %v865_v1  ;;  %v861_v2 = vld [vmem:[%s1357_s1] sm:$0xff]  ;;  %v864_v5 = vld [vmem:[%s1357_s1 + $0x18] sm:$0xff]  ;;  %vm630_vm12 = vcmask 7168  }
  0x30   : > { %867 = vmatpush.bf16.xpose.msra.mxu2 %v865_v1  ;;  %868 = vmatpush.bf16.xpose.msra.mxu3 %v865_v1  ;;  %v452_v6 = vld [vmem:[%s1360_s4] sm:$0x1]  ;;  %v1128_v52 = vshrl.u32 %v524_v45, 7  ;;  %v544_v53 = vand.u32 127, %v524_v45 }
  0x31   : > { %vm454_vm1 = vcmp.gt.f32.partialorder %v452_v6, 0.5  ;;  %v1138_v63 = vld [vmem:[%s337_s12] ss:$0 sm:$0xff] }
  0x32   : > { %v455_v8 = vsel %vm454_vm1, 1, %v969_v7  ;;  %v527_v59 = vadd.s32 16, %v1128_v52  ;;  %v1131_v60 = vadd.s32 %v545_v54, %v544_v53 }
  0x33   : > { %v456_v9 = vperm.slane %v455_v8, 0 }
  0x34   : > { %vm549_vm4 = vcmp.ne.s32.totalorder %v527_v59, %v1131_v60  ;;  %vm547_vm5 = vcmp.ne.s32.totalorder %v1128_v52, %v1131_v60 }
  0x35   : > { %vm1086_vm2 = vcmp.eq.s32.totalorder %v456_v9, 1 }
  0x36   : > { %423 = vmatmul.bf16.vlgmr.msra.gmra.mxu0 %v861_v2  ;;  %428 = vmatmul.bf16.vlgmr.msra.gmra.mxu1 %v862_v3 }
  0x37   : > { %433 = vmatmul.bf16.vlgmr.msra.gmra.mxu2 %v863_v4  ;;  %438 = vmatmul.bf16.vlgmr.msra.gmra.mxu3 %v864_v5 }
  0xb3   : > { %v424_v10 = vpop.f32.mrf.mxu0  ;;  %v429_v11 = vpop.f32.mrf.mxu1 }
  0xb4   : > { %v444_v13 = vmul.f32 5.0, %v424_v10  ;;  %v446_v14 = vmul.f32 5.0, %v429_v11 }
  0xb6   : > { %v460_v15 = vsel %vm1086_vm2, %v446_v14, -1e+30  ;;  %v458_v16 = vsel %vm1086_vm2, %v444_v13, -1e+30 }
  0xb7   : > { %v473_v17 = vsel %vm466_vm3, %v460_v15, -inf  ;;  %v467_v18 = vsel %vm466_vm3, %v458_v16, -inf }
  0xb8   : > { %474 = vmax.xlane.f32.xlu1 %v473_v17  ;;  %468 = vmax.xlane.f32.xlu0 %v467_v18 }
  0xba   : > { %v434_v19 = vpop.f32.mrf.mxu2  ;;  %v439_v20 = vpop.f32.mrf.mxu3 }
  0xbb   : > { %v448_v21 = vmul.f32 5.0, %v434_v19  ;;  %v426_v22 = vpop.f32.mrf.mxu0  ;;  %v431_v23 = vpop.f32.mrf.mxu1  ;;  %v1105_v32 = vmul.f32 5.0, %v439_v20  ;;  %v528_v19 = vadd.s32 24, %v1128_v52 }
  0xbc   : > { %v445_v24 = vmul.f32 5.0, %v426_v22  ;;  %v447_v25 = vmul.f32 5.0, %v431_v23 }
  0xbd   : > { %v462_v26 = vsel %vm1086_vm2, %v448_v21, -1e+30  ;;  %v464_v37 = vsel %vm1086_vm2, %v1105_v32, -1e+30  ;;  %vm550_vm7 = vcmp.ne.s32.totalorder %v528_v19, %v1131_v60  ;;  %v612_v19 = vld [vmem:[%s1361_s5 + $0x30] sm:$0xff] }
  0xbe   : > { %v479_v27 = vsel %vm466_vm3, %v462_v26, -inf  ;;  %v461_v28 = vsel %vm1086_vm2, %v447_v25, -1e+30  ;;  %v459_v29 = vsel %vm1086_vm2, %v445_v24, -1e+30  ;;  %v485_v42 = vsel %vm466_vm3, %v464_v37, -inf }
  0xbf   : > { %480 = vmax.xlane.f32.xlu2 %v479_v27  ;;  %v476_v30 = vsel %vm466_vm3, %v461_v28, -inf  ;;  %v470_v31 = vsel %vm466_vm3, %v459_v29, -inf  ;;  %v530_v37 = vadd.s32 40, %v1128_v52 }
  0xc0   : > { %477 = vmax.xlane.f32.xlu1 %v476_v30  ;;  %471 = vmax.xlane.f32.xlu0 %v470_v31 }
  0xc1   : > { %vm552_vm9 = vcmp.ne.s32.totalorder %v530_v37, %v1131_v60 }
  0xc2   : > { %v436_v33 = vpop.f32.mrf.mxu2  ;;  %v441_v34 = vpop.f32.mrf.mxu3 }
  0xc3   : > { %v1107_v35 = vmul.f32 5.0, %v436_v33  ;;  %v1109_v36 = vmul.f32 5.0, %v441_v34  ;;  %v526_v34 = vadd.s32 8, %v1128_v52 }
  0xc5   : > { %v463_v38 = vsel %vm1086_vm2, %v1107_v35, -1e+30  ;;  %v465_v39 = vsel %vm1086_vm2, %v1109_v36, -1e+30  ;;  %vm548_vm8 = vcmp.ne.s32.totalorder %v526_v34, %v1131_v60 }
  0xc6   : > { %v482_v40 = vsel %vm466_vm3, %v463_v38, -inf  ;;  %v488_v41 = vsel %vm466_vm3, %v465_v39, -inf }
  0xc7   : > { %483 = vmax.xlane.f32.xlu2 %v482_v40  ;;  %v531_v40 = vadd.s32 48, %v1128_v52 }
  0xc8   : > { %489 = vmax.xlane.f32.xlu1 %v488_v41  ;;  %486 = vmax.xlane.f32.xlu0 %v485_v42 }
  0xc9   : > { %vm553_vm10 = vcmp.ne.s32.totalorder %v531_v40, %v1131_v60 }
 0x12b   : > { %v475_v43 = vpop.xlane.xlu1 %474  ;;  %v469_v44 = vpop.xlane.xlu0 %468 }
 0x12c   : > { %v493_v46 = vsub.f32 %v446_v14, %v475_v43  ;;  %v491_v47 = vsub.f32 %v444_v13, %v469_v44  ;;  %v529_v13 = vadd.s32 32, %v1128_v52 }
 0x12e   : > { %v501_v48 = vsel %vm1086_vm2, %v493_v46, 0.0  ;;  %v499_v49 = vsel %vm1086_vm2, %v491_v47, 0.0  ;;  %vm551_vm6 = vcmp.ne.s32.totalorder %v529_v13, %v1131_v60  ;;  %v532_v46 = vadd.s32 56, %v1128_v52  ;;  %v611_v13 = vld [vmem:[%s1361_s5 + $0x28] sm:$0xff] }
 0x12f   : > { %v511_v50 = vmul.f32 1.442695, %v501_v48  ;;  %v507_v51 = vmul.f32 1.442695, %v499_v49 }
 0x130   : > { %vm554_vm11 = vcmp.ne.s32.totalorder %v532_v46, %v1131_v60  ;;  %v598_v60 = vld [vmem:[%s1363_s7] sm:$0xff] }
 0x131   : > { %897 = vpow2.f32 %v511_v50 }
 0x132   : > { %899 = vpow2.f32 %v507_v51  ;;  %v481_v55 = vpop.xlane.xlu2 %480 }
 0x133   : > { %v495_v56 = vsub.f32 %v448_v21, %v481_v55  ;;  %v478_v57 = vpop.xlane.xlu1 %477  ;;  %v472_v58 = vpop.xlane.xlu0 %471 }
 0x134   : > { %v494_v61 = vsub.f32 %v447_v25, %v478_v57  ;;  %v492_v62 = vsub.f32 %v445_v24, %v472_v58  ;;  %v606_v57 = vld [vmem:[%s1361_s5] sm:$0xff]  ;;  %v600_v58 = vld [vmem:[%s1363_s7 + $0x10] sm:$0xff] }
 0x135   : > { %v503_v0 = vsel %vm1086_vm2, %v495_v56, 0.0  ;;  %v608_v56 = vld [vmem:[%s1361_s5 + $0x10] sm:$0xff] }
 0x136   : > { %v515_v1 = vmul.f32 1.442695, %v503_v0  ;;  %v502_v2 = vsel %vm1086_vm2, %v494_v61, 0.0  ;;  %v500_v3 = vsel %vm1086_vm2, %v492_v62, 0.0 }
 0x137   : > { %v898_v4 = vpop.eup %897  ;;  %v513_v5 = vmul.f32 1.442695, %v502_v2  ;;  %v509_v6 = vmul.f32 1.442695, %v500_v3  ;;  %v610_v2 = vld [vmem:[%s1361_s5 + $0x20] sm:$0xff] }
 0x138   : > { %v900_v7 = vpop.eup %899  ;;  %901 = vpow2.f32 %v515_v1  ;;  %v560_v8 = vmul.f32 %v898_v4, %v1138_v63  ;;  %v602_v3 = vld [vmem:[%s1363_s7 + $0x20] sm:$0xff] }
 0x139   : > { %903 = vpow2.f32 %v513_v5  ;;  %v558_v9 = vmul.f32 %v900_v7, %v1138_v63  ;;  %v609_v5 = vld [vmem:[%s1361_s5 + $0x18] sm:$0xff] }
 0x13a   : > { %905 = vpow2.f32 %v509_v6  ;;  %v484_v10 = vpop.xlane.xlu2 %483  ;;  %v568_v11 = vsel %vm549_vm4, %v560_v8, 0.0  ;;  %v601_v7 = vld [vmem:[%s1363_s7 + $0x18] sm:$0xff] }
 0x13b   : > { %v496_v14 = vsub.f32 %v1107_v35, %v484_v10  ;;  %v490_v15 = vpop.xlane.xlu1 %489  ;;  %v487_v16 = vpop.xlane.xlu0 %486  ;;  %v580_v17 = vsel %vm466_vm3, %v568_v11, 0.0  ;;  %v566_v18 = vsel %vm547_vm5, %v558_v9, 0.0 }
 0x13c   : > { %v498_v20 = vsub.f32 %v1109_v36, %v490_v15  ;;  %v497_v21 = vsub.f32 %v1105_v32, %v487_v16  ;;  %581 = vadd.xlane.f32.xlu1 %v580_v17  ;;  %v574_v22 = vsel %vm466_vm3, %v566_v18, 0.0  ;;  %v603_v15 = vld [vmem:[%s1363_s7 + $0x28] sm:$0xff] }
 0x13d   : > { %v504_v23 = vsel %vm1086_vm2, %v496_v14, 0.0  ;;  %575 = vadd.xlane.f32.xlu2 %v574_v22  ;;  %v607_v14 = vld [vmem:[%s1361_s5 + $0x8] sm:$0xff]  ;;  %v604_v22 = vld [vmem:[%s1363_s7 + $0x30] sm:$0xff] }
 0x13e   : > { %v902_v24 = vpop.eup %901  ;;  %v517_v25 = vmul.f32 1.442695, %v504_v23  ;;  %v506_v26 = vsel %vm1086_vm2, %v498_v20, 0.0  ;;  %v505_v27 = vsel %vm1086_vm2, %v497_v21, 0.0  ;;  %v599_v17 = vld [vmem:[%s1363_s7 + $0x8] sm:$0xff] }
 0x13f   : > { %v904_v28 = vpop.eup %903  ;;  %v521_v29 = vmul.f32 1.442695, %v506_v26  ;;  %v519_v30 = vmul.f32 1.442695, %v505_v27  ;;  %v562_v31 = vmul.f32 %v902_v24, %v1138_v63 }
 0x140   : > { %v906_v32 = vpop.eup %905  ;;  %907 = vpow2.f32 %v517_v25  ;;  %v561_v33 = vmul.f32 %v904_v28, %v1138_v63  ;;  %v613_v28 = vld [vmem:[%s1361_s5 + $0x38] sm:$0xff] }
 0x141   : > { %909 = vpow2.f32 %v521_v29  ;;  %v570_v35 = vsel %vm551_vm6, %v562_v31, 0.0  ;;  %v559_v39 = vmul.f32 %v906_v32, %v1138_v63  ;;  %v605_v29 = vld [vmem:[%s1363_s7 + $0x38] sm:$0xff] }
 0x142   : > { %911 = vpow2.f32 %v519_v30  ;;  %v586_v12 = vsel %vm466_vm3, %v570_v35, 0.0  ;;  %v569_v36 = vsel %vm550_vm7, %v561_v33, 0.0 }
 0x143   : > { %587 = vadd.xlane.f32.xlu0 %v586_v12  ;;  %v583_v38 = vsel %vm466_vm3, %v569_v36, 0.0  ;;  %v567_v44 = vsel %vm548_vm8, %v559_v39, 0.0 }
 0x144   : > { %v577_v50 = vsel %vm466_vm3, %v567_v44, 0.0 }
 0x145   : > { %584 = vadd.xlane.f32.xlu2 %v583_v38 }
 0x146   : > { %v908_v41 = vpop.eup %907 }
 0x147   : > { %v910_v42 = vpop.eup %909  ;;  %v563_v43 = vmul.f32 %v908_v41, %v1138_v63 }
 0x148   : > { %v912_v45 = vpop.eup %911  ;;  %v565_v53 = vmul.f32 %v910_v42, %v1138_v63 }
 0x149   : > { %v571_v47 = vsel %vm552_vm9, %v563_v43, 0.0  ;;  %v564_v48 = vmul.f32 %v912_v45, %v1138_v63 }
 0x14a   : > { %v589_v49 = vsel %vm466_vm3, %v571_v47, 0.0  ;;  %v573_v55 = vsel %vm554_vm11, %v565_v53, 0.0 }
 0x14b   : > { %590 = vadd.xlane.f32.xlu1 %v589_v49  ;;  %578 = vadd.xlane.f32.xlu0 %v577_v50  ;;  %v572_v51 = vsel %vm553_vm10, %v564_v48, 0.0  ;;  %v595_v52 = vsel %vm466_vm3, %v573_v55, 0.0 }
 0x14c   : > { %v592_v54 = vsel %vm466_vm3, %v572_v51, 0.0 }
 0x14d   : > { %593 = vadd.xlane.f32.xlu2 %v592_v54 }
 0x153   : > { %596 = vadd.xlane.f32.xlu0 %v595_v52 }
 0x1af   : > { %v582_v59 = vpop.xlane.xlu1 %581 }
 0x1b0   : > { %v616_v61 = vmul.f32 %v608_v56, %v582_v59  ;;  %v576_v62 = vpop.xlane.xlu2 %575 }
 0x1b1   : > { %v614_v63 = vmul.f32 %v606_v57, %v576_v62 }
 0x1b2   : > { %v624_v0 = vadd.f32 %v616_v61, %v600_v58 }
 0x1b3   : > { %v622_v1 = vadd.f32 %v614_v63, %v598_v60 }
 0x1b4   : > { %633 = vst.msk [vmem:[%s1363_s7 + $0x10] sm:$0xff] %vm630_vm12, %v624_v0 }
 0x1b5   : > { %631 = vst.msk [vmem:[%s1363_s7] sm:$0xff] %vm630_vm12, %v622_v1 }
 0x1b6   : > { %v588_v4 = vpop.xlane.xlu0 %587 }
 0x1b7   : > { %v618_v6 = vmul.f32 %v610_v2, %v588_v4 }
 0x1b8   : > { %v585_v8 = vpop.xlane.xlu2 %584 }
 0x1b9   : > { %v626_v9 = vadd.f32 %v618_v6, %v602_v3  ;;  %v617_v10 = vmul.f32 %v609_v5, %v585_v8 }
 0x1bb   : > { %635 = vst.msk [vmem:[%s1363_s7 + $0x20] sm:$0xff] %vm630_vm12, %v626_v9  ;;  %v625_v11 = vadd.f32 %v617_v10, %v601_v7 }
 0x1bd   : > { %634 = vst.msk [vmem:[%s1363_s7 + $0x18] sm:$0xff] %vm630_vm12, %v625_v11 }
 0x1be   : > { %v591_v16 = vpop.xlane.xlu1 %590  ;;  %v579_v18 = vpop.xlane.xlu0 %578 }
 0x1bf   : > { %v619_v20 = vmul.f32 %v611_v13, %v591_v16  ;;  %v615_v21 = vmul.f32 %v607_v14, %v579_v18 }
 0x1c0   : > { %v594_v23 = vpop.xlane.xlu2 %593 }
 0x1c1   : > { %v627_v24 = vadd.f32 %v619_v20, %v603_v15  ;;  %v623_v25 = vadd.f32 %v615_v21, %v599_v17  ;;  %v620_v26 = vmul.f32 %v612_v19, %v594_v23 }
 0x1c3   : > { %636 = vst.msk [vmem:[%s1363_s7 + $0x28] sm:$0xff] %vm630_vm12, %v627_v24  ;;  %v628_v27 = vadd.f32 %v620_v26, %v604_v22 }
 0x1c4   : > { %632 = vst.msk [vmem:[%s1363_s7 + $0x8] sm:$0xff] %vm630_vm12, %v623_v25 }
 0x1c5   : > { %637 = vst.msk [vmem:[%s1363_s7 + $0x30] sm:$0xff] %vm630_vm12, %v628_v27 }
 0x1c6   : > { %v597_v30 = vpop.xlane.xlu0 %596 }
 0x1c7   : > { %v621_v31 = vmul.f32 %v613_v28, %v597_v30 }
 0x1c9   : > { %v629_v32 = vadd.f32 %v621_v31, %v605_v29 }
 0x1cb   : > { %638 = vst.msk [vmem:[%s1363_s7 + $0x38] sm:$0xff] %vm630_vm12, %v629_v32 }
 0x1cc PF: > { %p856_p8 = scmp.ne.s32.totalorder %s957_s28, 3 }
 0x1ce   : > { %642 = sbr.rel (%p856_p8) target bundleno = 489 (0x1e9), region = 56 }
 0x1d3   : > { %v643_v33 = vld [vmem:[%s1363_s7] sm:$0xff]  ;;  %v644_v34 = vld [vmem:[%s1363_s7 + $0x8] sm:$0xff]  ;;  %v645_v35 = vld [vmem:[%s1363_s7 + $0x10] sm:$0xff]  ;;  %vm699_vm5 = vcmask 7168  }
 0x1d4   : > { %vm651_vm13 = vcmp.le.f32.partialorder %v643_v33, 0.0  ;;  %vm652_vm14 = vcmp.le.f32.partialorder %v644_v34, 0.0  ;;  %vm653_vm15 = vcmp.le.f32.partialorder %v645_v35, 0.0  ;;  %v646_v37 = vld [vmem:[%s1363_s7 + $0x18] sm:$0xff]  ;;  %v647_v38 = vld [vmem:[%s1363_s7 + $0x20] sm:$0xff]  ;;  %v648_v40 = vld [vmem:[%s1363_s7 + $0x28] sm:$0xff] }
 0x1d5   : > { %v659_v12 = vsel %vm651_vm13, 1.0, %v643_v33  ;;  %v660_v36 = vsel %vm652_vm14, 1.0, %v644_v34  ;;  %v661_v39 = vsel %vm653_vm15, 1.0, %v645_v35  ;;  %vm654_vm0 = vcmp.le.f32.partialorder %v646_v37, 0.0  ;;  %v649_v43 = vld [vmem:[%s1363_s7 + $0x30] sm:$0xff]  ;;  %v650_v44 = vld [vmem:[%s1363_s7 + $0x38] sm:$0xff] }
 0x1d6   : > { %913 = vlog2.f32 %v659_v12  ;;  %vm655_vm1 = vcmp.le.f32.partialorder %v647_v38, 0.0  ;;  %v662_v41 = vsel %vm654_vm0, 1.0, %v646_v37  ;;  %vm656_vm2 = vcmp.le.f32.partialorder %v648_v40, 0.0  ;;  %v667_v49 = vld [vmem:[%s1362_s6] sm:$0xff]  ;;  %v668_v53 = vld [vmem:[%s1362_s6 + $0x8] sm:$0xff]  ;;  %v669_v52 = vld [vmem:[%s1362_s6 + $0x10] sm:$0xff] }
 0x1d7   : > { %915 = vlog2.f32 %v660_v36  ;;  %v663_v42 = vsel %vm655_vm1, 1.0, %v647_v38  ;;  %v664_v45 = vsel %vm656_vm2, 1.0, %v648_v40  ;;  %vm657_vm3 = vcmp.le.f32.partialorder %v649_v43, 0.0  ;;  %v670_v59 = vld [vmem:[%s1362_s6 + $0x18] sm:$0xff]  ;;  %v671_v63 = vld [vmem:[%s1362_s6 + $0x20] sm:$0xff]  ;;  %v672_v3 = vld [vmem:[%s1362_s6 + $0x28] sm:$0xff] }
 0x1d8   : > { %917 = vlog2.f32 %v661_v39  ;;  %vm658_vm4 = vcmp.le.f32.partialorder %v650_v44, 0.0  ;;  %v665_v46 = vsel %vm657_vm3, 1.0, %v649_v43  ;;  %v673_v7 = vld [vmem:[%s1362_s6 + $0x30] sm:$0xff]  ;;  %v674_v11 = vld [vmem:[%s1362_s6 + $0x38] sm:$0xff] }
 0x1d9   : > { %919 = vlog2.f32 %v662_v41  ;;  %v666_v47 = vsel %vm658_vm4, 1.0, %v650_v44 }
 0x1da   : > { %921 = vlog2.f32 %v663_v42 }
 0x1db   : > { %923 = vlog2.f32 %v664_v45 }
 0x1dc   : > { %v914_v48 = vpop.eup %913  ;;  %925 = vlog2.f32 %v665_v46 }
 0x1dd   : > { %v916_v50 = vpop.eup %915  ;;  %v676_v51 = vmul.f32 0.6931472, %v914_v48  ;;  %927 = vlog2.f32 %v666_v47 }
 0x1de   : > { %v918_v54 = vpop.eup %917  ;;  %v678_v55 = vmul.f32 0.6931472, %v916_v50 }
 0x1df   : > { %v920_v56 = vpop.eup %919  ;;  %v691_v57 = vmul.f32 %v676_v51, %v667_v49  ;;  %v680_v58 = vmul.f32 0.6931472, %v918_v54 }
 0x1e0   : > { %v922_v61 = vpop.eup %921  ;;  %v692_v60 = vmul.f32 %v678_v55, %v668_v53  ;;  %v682_v62 = vmul.f32 0.6931472, %v920_v56 }
 0x1e1   : > { %v924_v0 = vpop.eup %923  ;;  %700 = vst.msk [vmem:[%s1363_s7] sm:$0xff] %vm699_vm5, %v691_v57  ;;  %v693_v1 = vmul.f32 %v680_v58, %v669_v52  ;;  %v684_v2 = vmul.f32 0.6931472, %v922_v61 }
 0x1e2   : > { %v926_v4 = vpop.eup %925  ;;  %701 = vst.msk [vmem:[%s1363_s7 + $0x8] sm:$0xff] %vm699_vm5, %v692_v60  ;;  %v694_v5 = vmul.f32 %v682_v62, %v670_v59  ;;  %v686_v6 = vmul.f32 0.6931472, %v924_v0 }
 0x1e3   : > { %v928_v8 = vpop.eup %927  ;;  %702 = vst.msk [vmem:[%s1363_s7 + $0x10] sm:$0xff] %vm699_vm5, %v693_v1  ;;  %v695_v9 = vmul.f32 %v684_v2, %v671_v63  ;;  %v688_v10 = vmul.f32 0.6931472, %v926_v4 }
 0x1e4   : > { %703 = vst.msk [vmem:[%s1363_s7 + $0x18] sm:$0xff] %vm699_vm5, %v694_v5  ;;  %v696_v13 = vmul.f32 %v686_v6, %v672_v3  ;;  %v690_v14 = vmul.f32 0.6931472, %v928_v8 }
 0x1e5   : > { %704 = vst.msk [vmem:[%s1363_s7 + $0x20] sm:$0xff] %vm699_vm5, %v695_v9  ;;  %v697_v15 = vmul.f32 %v688_v10, %v673_v7 }
 0x1e6   : > { %705 = vst.msk [vmem:[%s1363_s7 + $0x28] sm:$0xff] %vm699_vm5, %v696_v13  ;;  %v698_v16 = vmul.f32 %v690_v14, %v674_v11 }
 0x1e7   : > { %706 = vst.msk [vmem:[%s1363_s7 + $0x30] sm:$0xff] %vm699_vm5, %v697_v15 }
 0x1e8   : > { %707 = vst.msk [vmem:[%s1363_s7 + $0x38] sm:$0xff] %vm699_vm5, %v698_v16 }
 0x1e9 PF: > { %s25_s30 = sadd.s32 1, %s965_s30   ;;  %s1366_s28 = smov %s961_s29 }
 0x1ea   : > { %p22_p9 = scmp.ge.s32.totalorder %s25_s30, 6   ;;  %s1367_s29 = smov %s1369_s0 }
 0x1ec   :  { %24 = sbr.rel (!%p22_p9) target bundleno = 8 (0x8), region = 98 }

</bundles_post_ra>
